<compile_context>
chip_gen: v5e
topology: v5e:2x2
jax: 0.10.0
libtpu: 0.0.40
codegen_flags: <defaults>
</compile_context>

<pallas_src>
import functools

import jax
import jax.numpy as jnp
from jax.experimental import pallas as pl
from jax.experimental.pallas import tpu as pltpu


def _layernorm_kernel(x_ref, a_ref, b_ref, o_ref, *, eps, features):
    # x_ref: (tile_rows, features); a_ref / b_ref: (1, features)
    x = x_ref[...].astype(jnp.float32)

    # Two independent cross-lane reductions (can overlap on the XLU units).
    sum_x = jnp.sum(x, axis=-1, keepdims=True)
    sum_xx = jnp.sum(x * x, axis=-1, keepdims=True)

    mean = sum_x * (1.0 / features)
    # Unbiased (ddof=1) variance, matching torch.Tensor.std default:
    #   sum((x - mean)^2) == sum(x^2) - sum(x) * mean
    var = (sum_xx - sum_x * mean) / (features - 1)
    var = jnp.maximum(var, 0.0)
    std = jnp.sqrt(var)

    # Per-row reciprocal (tile_rows values) instead of a full-tile divide;
    # exact 1/x keeps parity with the PyTorch reference.
    inv = 1.0 / (std + eps)

    diff = x - mean
    a = a_ref[...].astype(jnp.float32)
    b = b_ref[...].astype(jnp.float32)
    o_ref[...] = ((diff * inv) * a + b).astype(o_ref.dtype)


def _choose_tile_rows(rows, features, dtype_bytes, *, max_tile_bytes=8 << 20):
    """Pick a large, VMEM-safe row tile (multiple of 8).

    Budget: ~4x tile (x + out, double-buffered) must stay well under the
    48 MiB vmem_limit we request, so cap a single tile at ~8 MiB. Also keep
    the grid reasonably deep so the 'parallel' axis can shard across cores.
    """
    row_bytes = max(1, features * dtype_bytes)
    cap = (max_tile_bytes // row_bytes) // 8 * 8
    cap = max(8, min(cap, 1024))          # >1024 rows gives diminishing returns
    # Aim for >= ~8 grid steps when there is enough work.
    target = max(8, pl.cdiv(rows, 8))
    target = pl.cdiv(target, 8) * 8       # round up to a multiple of 8
    return max(8, min(cap, target))


def layer_norm(x, a_2, b_2, eps=1e-6, *, tile_rows=None):
    """x: [..., features]; a_2, b_2: [features]."""
    features = x.shape[-1]
    lead_shape = x.shape[:-1]
    rows = 1
    for d in lead_shape:
        rows *= d

    x2d = x.reshape(rows, features)
    a2d = a_2.reshape(1, features)
    b2d = b_2.reshape(1, features)

    if tile_rows is None:
        dtype_bytes = jnp.dtype(x.dtype).itemsize
        tile_rows = _choose_tile_rows(rows, features, dtype_bytes)

    grid = (pl.cdiv(rows, tile_rows),)  # ragged last block: OOB writes masked

    kernel = functools.partial(_layernorm_kernel, eps=eps, features=features)

    out = pl.pallas_call(
        kernel,
        out_shape=jax.ShapeDtypeStruct((rows, features), x.dtype),
        grid_spec=pltpu.PrefetchScalarGridSpec(
            num_scalar_prefetch=0,
            grid=grid,
            in_specs=[
                pl.BlockSpec((tile_rows, features), lambda i: (i, 0)),
                pl.BlockSpec((1, features), lambda i: (0, 0)),
                pl.BlockSpec((1, features), lambda i: (0, 0)),
            ],
            out_specs=pl.BlockSpec((tile_rows, features), lambda i: (i, 0)),
        ),
        compiler_params=pltpu.CompilerParams(
            dimension_semantics=("parallel",),
            vmem_limit_bytes=48 << 20,  # safe on v5e/v6e (128 MiB) and v7x (64 MiB)
        ),
    )(x2d, a2d, b2d)

    return out.reshape(*lead_shape, features)


if __name__ == "__main__":
    key = jax.random.PRNGKey(0)
    batch, seq, hidden = 2, 8, 32

    x = jax.random.normal(key, (batch, seq, hidden), dtype=jnp.float32)

    # Deterministic parameter init matching nn.Parameter(torch.ones/zeros(features))
    a_2 = jnp.ones((hidden,), dtype=jnp.float32)
    b_2 = jnp.zeros((hidden,), dtype=jnp.float32)

    y = layer_norm(x, a_2, b_2, eps=1e-6)
    y = jax.block_until_ready(y)

    # Reference check in plain JAX (unbiased std, eps added to std)
    mean = jnp.mean(x, axis=-1, keepdims=True)
    std = jnp.std(x, axis=-1, keepdims=True, ddof=1)
    ref = a_2 * (x - mean) / (std + 1e-6) + b_2
    assert jnp.allclose(y, ref, atol=1e-5, rtol=1e-5), "mismatch vs reference"

    print("KERNEL_OK")
</pallas_src>

<mosaic_0001>
module attributes {stable_mosaic.version = 11 : i64} {
  func.func @_layernorm_kernel(%arg0: i32, %arg1: memref<8x32xf32, #tpu.memory_space<vmem>>, %arg2: memref<1x32xf32, #tpu.memory_space<vmem>>, %arg3: memref<1x32xf32, #tpu.memory_space<vmem>>, %arg4: memref<8x32xf32, #tpu.memory_space<vmem>>) attributes {dimension_semantics = [#tpu.dimension_semantics<parallel>], iteration_bounds = array<i64: 2>, scalar_prefetch = 0 : i64, scratch_operands = 0 : i64, tpu.core_type = #tpu.core_type<tc>, window_params = [{transform_indices = @transform_0, window_bounds = array<i64: 8, 32>}, {pipeline_mode = #tpu.pipeline_mode<synchronous>, transform_indices = @transform_1, window_bounds = array<i64: 1, 32>}, {pipeline_mode = #tpu.pipeline_mode<synchronous>, transform_indices = @transform_2, window_bounds = array<i64: 1, 32>}, {transform_indices = @transform_3, window_bounds = array<i64: 8, 32>}]} {
    %c0 = arith.constant 0 : index
    %c0_0 = arith.constant 0 : index
    %0 = vector.load %arg1[%c0, %c0_0] : memref<8x32xf32, #tpu.memory_space<vmem>>, vector<8x32xf32>
    %cst = arith.constant dense<0.000000e+00> : vector<8xf32>
    %1 = vector.multi_reduction <add>, %0, %cst [1] : vector<8x32xf32> to vector<8xf32>
    %2 = vector.shape_cast %1 : vector<8xf32> to vector<8x1xf32>
    %3 = arith.mulf %0, %0 : vector<8x32xf32>
    %cst_1 = arith.constant dense<0.000000e+00> : vector<8xf32>
    %4 = vector.multi_reduction <add>, %3, %cst_1 [1] : vector<8x32xf32> to vector<8xf32>
    %5 = vector.shape_cast %4 : vector<8xf32> to vector<8x1xf32>
    %cst_2 = arith.constant 3.125000e-02 : f32
    %6 = vector.broadcast %cst_2 : f32 to vector<8x1xf32>
    %7 = arith.mulf %2, %6 : vector<8x1xf32>
    %8 = arith.mulf %2, %7 : vector<8x1xf32>
    %9 = arith.subf %5, %8 : vector<8x1xf32>
    %cst_3 = arith.constant 3.100000e+01 : f32
    %10 = vector.broadcast %cst_3 : f32 to vector<8x1xf32>
    %11 = arith.divf %9, %10 : vector<8x1xf32>
    %cst_4 = arith.constant 0.000000e+00 : f32
    %12 = vector.broadcast %cst_4 : f32 to vector<8x1xf32>
    %13 = arith.maximumf %11, %12 : vector<8x1xf32>
    %14 = math.sqrt %13 : vector<8x1xf32>
    %cst_5 = arith.constant 9.99999997E-7 : f32
    %15 = vector.broadcast %cst_5 : f32 to vector<8x1xf32>
    %16 = arith.addf %14, %15 : vector<8x1xf32>
    %cst_6 = arith.constant 1.000000e+00 : f32
    %17 = vector.broadcast %cst_6 : f32 to vector<8x1xf32>
    %18 = arith.divf %17, %16 : vector<8x1xf32>
    %19 = vector.broadcast %7 : vector<8x1xf32> to vector<8x32xf32>
    %20 = arith.subf %0, %19 : vector<8x32xf32>
    %c0_7 = arith.constant 0 : index
    %c0_8 = arith.constant 0 : index
    %21 = vector.load %arg2[%c0_7, %c0_8] : memref<1x32xf32, #tpu.memory_space<vmem>>, vector<1x32xf32>
    %c0_9 = arith.constant 0 : index
    %c0_10 = arith.constant 0 : index
    %22 = vector.load %arg3[%c0_9, %c0_10] : memref<1x32xf32, #tpu.memory_space<vmem>>, vector<1x32xf32>
    %23 = vector.broadcast %18 : vector<8x1xf32> to vector<8x32xf32>
    %24 = arith.mulf %20, %23 : vector<8x32xf32>
    %25 = vector.broadcast %21 : vector<1x32xf32> to vector<8x32xf32>
    %26 = arith.mulf %24, %25 : vector<8x32xf32>
    %27 = vector.broadcast %22 : vector<1x32xf32> to vector<8x32xf32>
    %28 = arith.addf %26, %27 : vector<8x32xf32>
    %c0_11 = arith.constant 0 : index
    %c0_12 = arith.constant 0 : index
    %29 = vector.load %arg4[%c0_11, %c0_12] : memref<8x32xf32, #tpu.memory_space<vmem>>, vector<8x32xf32>
    tpu.vector_store %arg4[%c0_11, %c0_12], %28 {strides = array<i32>} : memref<8x32xf32, #tpu.memory_space<vmem>>, vector<8x32xf32>,
    return
  }
  func.func @transform_0(%arg0: i32) -> (i32, i32) {
    %c0_i32 = arith.constant 0 : i32
    %c0_i32_0 = arith.constant 0 : i32
    return %arg0, %c0_i32 : i32, i32
  }
  func.func @transform_1(%arg0: i32) -> (i32, i32) {
    %c0_i32 = arith.constant 0 : i32
    %c0_i32_0 = arith.constant 0 : i32
    %c0_i32_1 = arith.constant 0 : i32
    return %c0_i32, %c0_i32_0 : i32, i32
  }
  func.func @transform_2(%arg0: i32) -> (i32, i32) {
    %c0_i32 = arith.constant 0 : i32
    %c0_i32_0 = arith.constant 0 : i32
    %c0_i32_1 = arith.constant 0 : i32
    return %c0_i32, %c0_i32_0 : i32, i32
  }
  func.func @transform_3(%arg0: i32) -> (i32, i32) {
    %c0_i32 = arith.constant 0 : i32
    %c0_i32_0 = arith.constant 0 : i32
    return %arg0, %c0_i32 : i32, i32
  }
}

</mosaic_0001>

<bundles_post_ra>
// kernel: tpu_custom_call.1
= control target key start
LH: loop header
LB: loop body
LE: loop exit
PB: predicated region body
PF: predicated region fallthrough
CT: control target
= control target key end

     0   :  { %8 = vsyncpa [#allocation3], 0  ;;  %s743_s0 = inlined_call_operand.hbm [shape: f32[16,32], index: 0, kind: input, shape index: {}]   ;;  %s744_s1 = inlined_call_operand.hbm [shape: f32[1,32], index: 1, kind: input, shape index: {}]   ;;  %s745_s2 = inlined_call_operand.vmem [shape: f32[1,32], index: 2, kind: input, shape index: {}]   ;;  %s746_s3 = inlined_call_operand.hbm [shape: f32[16,32], index: 3, kind: output, shape index: {}]  }
   0x1   :  { %10 = vsyncpa [#allocation3 + $0x1], 0 }
   0x2   :  { %11 = vsyncpa [#allocation6], 0 }
   0x3   :  { %12 = vsyncpa [#allocation4], 0 }
   0x4   :  { %14 = vsyncpa [#allocation4 + $0x1], 0  ;;  %s595_s12 = smov 0   ;;  %s597_s13 = smov 0  }
   0x5   :  { %s599_s14 = smov 0   ;;  %s601_s15 = smov 0  }
   0x6 LB: > { %s616_s16 = sadd.s32 4294967295, %s571_s15   ;;  %s361_s17 = sadd.s32 4294967294, %s571_s15   ;;  %s571_s15 = sphi %s601_s15, %s756_s15   ;;  %s567_s14 = sphi %s599_s14, %s755_s14   ;;  %s563_s13 = sphi %s597_s13, %s754_s13   ;;  %s559_s12 = sphi %s595_s12, %s753_s12  }
   0x7   : > { %p40_p0 = scmp.ne.s32.totalorder %s563_s13, %s559_s12  ;;  %p41_p1 = scmp.eq.s32.totalorder %s616_s16, 0 }
   0x8   : > { %p106_p2 = scmp.eq.s32.totalorder %s616_s16, 1  ;;  %p112_p3 = scmp.eq.s32.totalorder %s361_s17, 1 }
   0x9   : > { %p625_p4 = por %p41_p1, %p40_p0  ;;  %p362_p5 = scmp.ge.s32.totalorder %s571_s15, 1 }
   0xa   : > { %p630_p6 = por %p112_p3, %p40_p0  ;;  %p119_p7 = scmp.lt.s32.totalorder %s571_s15, 3 }
   0xb   : > { %s131_s22 = sshll.u32 %s744_s1, 4  ;;  %s573_s24 = smov [#allocation5]   ;;  %s132_s22 = int_to_ptr.hbm [resolvable:$true] %s131_s22 }
   0xc   : > { %p638_p8 = pnand %p362_p5, %p119_p7  ;;  %s133_s25 = sshll.u32 %s573_s24, 4  ;;  %s134_s25 = int_to_ptr.vmem [resolvable:$true] %s133_s25 }
   0xd   : > { %s648_s26 = sadd.s32 1, %s571_s15   ;;  %s27_s27 = sadd.s32 1, %s567_s14 }
   0xe   : > { %p383_p10 = pneg %p638_p8  ;;  %s24_s28 = ssub.s32 %s571_s15, %s648_s26 }
   0xf   : > { %p25_p12 = scmp.eq.s32.totalorder %s24_s28, 0  ;;  %p34_p13 = scmp.ne.s32.totalorder %s567_s14, %s563_s13 }
  0x10   : > { %p384_p11 = pnand %p383_p10, %p41_p1  ;;  %p35_p0 = scmp.eq.s32.totalorder %s571_s15, 0 }
  0x11   : > { %s657_s29 = scalar_select %p25_p12, %s567_s14, %s27_s27  }
  0x12   : > { %386 = dma.hbm_to_vmem [thread:$0]  (!%p384_p11), %s132_s22, 16, %s134_s25, [#allocation6]  }
  0x13   : > { %p661_p3 = por %p106_p2, %p34_p13  ;;  %p396_p5 = scmp.lt.s32.totalorder %s571_s15, 2 }
  0x14   : > { %s147_s4 = sand.u32 1, %s567_s14   ;;  %s366_s5 = sshll.u32 %s571_s15, 3 }
  0x15   : > { %p36_p7 = por %p35_p0, %p34_p13  ;;  %s365_s6 = sshll.u32 %s147_s4, 3 }
  0x16   : > { %s155_s9 = scalar_lea.hbm %s743_s0, %s366_s5  ;;  %s151_s11 = scalar_lea.vmem [#allocation2], %s365_s6 }
  0x17   : > { %s157_s10 = sshll.u32 %s155_s9, 4  ;;  %s159_s17 = sshll.u32 %s151_s11, 4  ;;  %s158_s10 = int_to_ptr.hbm [resolvable:$true] %s157_s10  ;;  %s160_s17 = int_to_ptr.vmem [resolvable:$true] %s159_s17 }
  0x18   : > { %p671_p10 = pnand %p396_p5, %p36_p7  ;;  %s148_s21 = scalar_lea.sflag [#allocation3], %s147_s4 }
  0x19   : > { %s471_s22 = sshra.s32 %s158_s10, 4  ;;  %s478_s28 = scalar_lea.hbm %s743_s0, 16  ;;  %s472_s22 = int_to_ptr.hbm [resolvable:$true] %s471_s22 }
  0x1a   : > { %s473_s24 = scalar_lea.hbm %s472_s22, 8  ;;  %p475_p11 = pneg %p671_p10 }
  0x1b   : > { %p474_p2 = scmp.ne.s32.totalorder %s472_s22, %s473_s24  ;;  %p479_p0 = scmp.lt.s32.totalorder %s472_s22, %s743_s0 }
  0x1c   : > { %p480_p5 = scmp.lt.s32.totalorder %s478_s28, %s473_s24 }
  0x1d   : > { %p476_p12 = pnand %p475_p11, %p474_p2 }
  0x1e   : > { %p481_p7 = por %p480_p5, %p479_p0 }
  0x1f   : > { %p477_p13 = pneg %p476_p12 }
  0x21   : > { %p482_p9 = pnand %p481_p7, %p477_p13 }
  0x23   : > { %485 = shalt.err (!%p482_p9)
}
  0x24   : > { %390 = dma.hbm_to_vmem [thread:$0]  (!%p671_p10), %s158_s10, 128, %s160_s17, %s148_s21  }
  0x25   : > { %168 = sbr.rel (%p638_p8) target bundleno = 226 (0xe2), region = 32  ;;  %s688_s4 = sand.u32 (!%p638_p8), 1, %s563_s13  }
  0x26   : > { %s368_s7 = sshll.u32 (!%p638_p8), %s688_s4, 3  ;;  %s171_s8 = scalar_lea.sflag (!%p638_p8), [#allocation3], %s688_s4 }
  0x27   : > { %s174_s9 = scalar_lea.vmem (!%p638_p8), [#allocation2], %s368_s7 }
  0x2a   : > { %546 = dma.done.wait (%p625_p4), %s171_s8, 128  }
  0x2b   : > { %548 = vsyncadd (%p625_p4), %s171_s8, 4294967168 }
  0x2c   : > { %550 = dma.done.wait (%p41_p1), [#allocation6], 16  }
  0x2d   : > { %552 = vsyncadd (%p41_p1), [#allocation6], 4294967280  ;;  %vm204_vm0 = vcmask 261120   ;;  %v203_v0 = vld [vmem:[%s174_s9] sm:$0xff]  ;;  %v574_v4 = vmov 31.0   ;;  %s372_s18 = sshll.u32 %s616_s16, 3 }
  0x2e   : > { %v205_v1 = vsel %vm204_vm0, %v203_v0, 0.0  ;;  %v208_v2 = vmul.f32 %v203_v0, %v203_v0  ;;  %435 = vrcp.f32 %v574_v4  ;;  %v433_v39 = vld [vmem:[#allocation5] ss:$0 sm:$0xff]  ;;  %s276_s11 = scalar_lea.hbm %s746_s3, %s372_s18  ;;  %v434_v42 = vld [vmem:[%s745_s2] ss:$0 sm:$0xff]  ;;  %s202_s16 = scalar_lea.vmem [#allocation7], %s368_s7 }
  0x2f   : > { %206 = vadd.xlane.f32.xlu0 %v205_v1  ;;  %s278_s21 = sshll.u32 %s202_s16, 4  ;;  %s280_s22 = sshll.u32 %s276_s11, 4  ;;  %s279_s21 = int_to_ptr.vmem [resolvable:$true] %s278_s21  ;;  %s281_s22 = int_to_ptr.hbm [resolvable:$true] %s280_s22 }
  0x30   : > { %v209_v3 = vsel %vm204_vm0, %v208_v2, 0.0  ;;  %s266_s24 = scalar_lea.sflag [#allocation4], %s688_s4  ;;  %s515_s25 = sshra.s32 %s281_s22, 4  ;;  %s516_s25 = int_to_ptr.hbm [resolvable:$true] %s515_s25 }
  0x31   : > { %s517_s27 = scalar_lea.hbm %s516_s25, 8  ;;  %s521_s6 = scalar_lea.hbm %s746_s3, 16 }
  0x32   : > { %p518_p1 = scmp.ne.s32.totalorder %s516_s25, %s517_s27  ;;  %p522_p9 = scmp.lt.s32.totalorder %s516_s25, %s746_s3 }
  0x33   : > { %p523_p10 = scmp.lt.s32.totalorder %s521_s6, %s517_s27 }
  0x34   : > { %v436_v5 = vpop.eup %435  ;;  %p519_p4 = pnand %p518_p1, %p661_p3 }
  0x35   : > { %v216_v6 = vmul.f32 31.0, %v436_v5  ;;  %vm220_vm1 = vweird.f32 %v436_v5  ;;  %p524_p2 = por %p523_p10, %p522_p9 }
  0x36   : > { %p520_p8 = pneg %p519_p4 }
  0x37   : > { %210 = vadd.xlane.f32.xlu0 %v209_v3  ;;  %v217_v7 = vsub.f32 1.0, %v216_v6 }
  0x38   : > { %p525_p11 = pnand %p524_p2, %p520_p8 }
  0x39   : > { %v218_v9 = vmul.f32 %v436_v5, %v217_v7 }
  0x3b   : > { %v219_v11 = vadd.f32 %v436_v5, %v218_v9 }
  0x3d   : > { %v221_v13 = vsel %vm220_vm1, %v436_v5, %v219_v11 }
  0xa2   : > { %v207_v8 = vpop.xlane.xlu0 %206 }
  0xa3   : > { %v212_v10 = vmul.f32 0.03125, %v207_v8 }
  0xa5   : > { %v213_v12 = vmul.f32 %v212_v10, %v207_v8  ;;  %v252_v37 = vsub.f32 %v203_v0, %v212_v10 }
  0xaa   : > { %v211_v14 = vpop.xlane.xlu0 %210 }
  0xab   : > { %v214_v15 = vsub.f32 %v211_v14, %v213_v12 }
  0xad   : > { %v222_v16 = vmul.f32 %v221_v13, %v214_v15 }
  0xaf   : > { %v223_v17 = vmax.f32 %v222_v16, 0.0 }
  0xb1   : > { %437 = vrsqrt.f32 %v223_v17  ;;  %vm231_vm2 = vcmp.eq.f32.partialorder %v223_v17, inf  ;;  %v234_v25 = vand.u32 2147483648, %v223_v17  ;;  %vm233_vm3 = vcmp.eq.f32.partialorder %v223_v17, 0.0 }
  0xb7   : > { %v438_v18 = vpop.eup %437 }
  0xb8   : > { %v225_v19 = vmul.f32 %v438_v18, %v223_v17 }
  0xba   : > { %v226_v20 = vmul.f32 %v438_v18, %v225_v19 }
  0xbc   : > { %v227_v21 = vmul.f32 0.5, %v226_v20 }
  0xbe   : > { %v228_v22 = vsub.f32 1.5, %v227_v21 }
  0xc0   : > { %v229_v23 = vmul.f32 %v438_v18, %v228_v22 }
  0xc2   : > { %v230_v24 = vmul.f32 %v229_v23, %v223_v17 }
  0xc4   : > { %v232_v26 = vsel %vm231_vm2, %v223_v17, %v230_v24 }
  0xc5   : > { %v235_v27 = vsel %vm233_vm3, %v234_v25, %v232_v26 }
  0xc6   : > { %v236_v28 = vadd.f32 1e-06, %v235_v27 }
  0xc8   : > { %439 = vrcp.f32 %v236_v28  ;;  %v248_v32 = vand.u32 2147483648, %v236_v28  ;;  %v246_v34 = vand.u32 2147483647, %v236_v28  ;;  %vm242_vm5 = vweird.f32 %v236_v28 }
  0xca   : > { %v249_v36 = vor.u32 1.1754944e-38, %v248_v32  ;;  %vm247_vm7 = vcmp.eq.f32.partialorder %v246_v34, 8.507059e+37 }
  0xce   : > { %v440_v29 = vpop.eup %439 }
  0xcf   : > { %v238_v30 = vmul.f32 %v440_v29, %v236_v28  ;;  %vm243_vm4 = vweird.f32 %v440_v29 }
  0xd0   : > { %vm244_vm6 = vmor %vm242_vm5, %vm243_vm4 }
  0xd1   : > { %v239_v31 = vsub.f32 1.0, %v238_v30 }
  0xd3   : > { %v240_v33 = vmul.f32 %v440_v29, %v239_v31 }
  0xd5   : > { %v241_v35 = vadd.f32 %v440_v29, %v240_v33 }
  0xd7   : > { %v245_v38 = vsel %vm244_vm6, %v440_v29, %v241_v35 }
  0xd8   : > { %v250_v40 = vsel %vm247_vm7, %v249_v36, %v245_v38 }
  0xd9   : > { %v255_v41 = vmul.f32 %v252_v37, %v250_v40 }
  0xdb   : > { %v259_v43 = vmul.f32 %v433_v39, %v255_v41 }
  0xdd   : > { %v263_v44 = vadd.f32 %v434_v42, %v259_v43 }
  0xdf   : > { %264 = vst.msk [vmem:[%s202_s16] sm:$0xff] %vm204_vm0, %v263_v44 }
  0xe0   : > { %528 = shalt.err (!%p525_p11)
}
  0xe1   : > { %381 = dma.vmem_to_hbm [thread:$0]  (%p661_p3), %s279_s21, 128, %s281_s22, %s266_s24  }
  0xe2 PF: > { %s292_s4 = sand.u32 1, %s559_s12   ;;  %p752_p12 = scmp.ge.s32.totalorder %s571_s15, 2 }
  0xe3   : > { %s293_s9 = scalar_lea.sflag [#allocation4], %s292_s4 }
  0xe4   : > { %p392_p13 = pnand %p752_p12, %p630_p6 }
  0xe6   : > { %p393_p0 = pneg %p392_p13 }
  0xe8   : > { %554 = dma.done.wait (%p393_p0), %s293_s9, 128  }
  0xe9   : > { %556 = vsyncadd (%p393_p0), %s293_s9, 4294967168  ;;  %p17_p5 = scmp.ge.s32.totalorder %s648_s26, 4   ;;  %s753_s12 = smov %s563_s13 }
  0xea   : > { %s754_s13 = smov %s567_s14  ;;  %s755_s14 = smov %s657_s29 }
  0xeb   : > { %s756_s15 = smov %s648_s26  ;;  %19 = sbr.rel (!%p17_p5) target bundleno = 6 (0x6), region = 81 }
  0xf0   :  { %299 = vsyncpa [#allocation3], 1 }
  0xf1   :  { %301 = vsyncpa [#allocation3 + $0x1], 1 }
  0xf2   :  { %302 = vsyncpa [#allocation6], 1 }
  0xf3   :  { %303 = vsyncpa [#allocation4], 1 }
  0xf4   :  { %305 = vsyncpa [#allocation4 + $0x1], 1 }

</bundles_post_ra>
